<compile_context>
chip_gen: v7x
topology: tpu7x:2x2x1
jax: 0.10.0
libtpu: 0.0.40
codegen_flags: <defaults>
</compile_context>

<pallas_src>
import functools
import math

import jax
import jax.numpy as jnp
from jax.experimental import pallas as pl
from jax.experimental.pallas import tpu as pltpu


def _round_up(x: int, m: int) -> int:
    return (x + m - 1) // m * m


# ---------------------------------------------------------------------------
# Pallas kernel: fused MLP (all layers chained inside one kernel body)
# ---------------------------------------------------------------------------
def _mlp_kernel(x_ref, *refs, num_layers: int, compute_dtype):
    # refs = (w1, b1, w2, b2, ..., wN, bN, o_ref)
    o_ref = refs[-1]
    # Cast to the MXU compute dtype *inside* the kernel (x arrives as f32).
    h = x_ref[...].astype(compute_dtype)             # [tile_m, in_dim]
    for li in range(num_layers):                     # unrolled: distinct weights/layer
        w = refs[2 * li][...]                        # [k, n]  compute_dtype
        b = refs[2 * li + 1][...]                    # [1, n]  f32
        y = jnp.dot(h, w, preferred_element_type=jnp.float32) + b   # f32 accum + bias
        if li < num_layers - 1:
            # ReLU in f32 (v5e VPU has no bf16 path), single cast for next MXU op.
            h = jnp.maximum(y, 0.0).astype(compute_dtype)
        else:
            o_ref[...] = y.astype(o_ref.dtype)


# ---------------------------------------------------------------------------
# One-time parameter preparation (hoisted out of the per-call path)
# ---------------------------------------------------------------------------
def prepare_mlp_params(params, compute_dtype=jnp.bfloat16):
    """Cast weights to the MXU compute dtype once; biases stay f32 [1, n]."""
    prepared = []
    for (w, b) in params:
        prepared.append((w.astype(compute_dtype), b.astype(jnp.float32)))
    return prepared


# ---------------------------------------------------------------------------
# Wrapper: tiling + pallas_call (no feature padding, no per-call weight prep)
# ---------------------------------------------------------------------------
def mlp_forward(prepared_params, x, *, max_tile_m: int = 1024):
    """x: [..., input_dim] f32 -> [..., output_dim] f32 (ReLU between layers)."""
    lead_shape = x.shape[:-1]
    in_dim = x.shape[-1]
    x2d = x.reshape(-1, in_dim).astype(jnp.float32)
    M = x2d.shape[0]
    num_layers = len(prepared_params)

    dims = [in_dim] + [w.shape[1] for (w, _) in prepared_params]
    out_dim = dims[-1]
    max_dim = max(dims)

    # ---- tile_m selection ---------------------------------------------------
    # VMEM budget (v7x-safe): double-buffered x/out tiles + f32/bf16
    # intermediates per row, plus double-buffered (tiny) resident weights.
    weight_bytes = sum(w.size * w.dtype.itemsize + b.size * b.dtype.itemsize
                       for (w, b) in prepared_params)
    per_row_bytes = 4 * (2 * in_dim + 2 * out_dim + 3 * max_dim)
    vmem_budget = 40 * 1024 * 1024
    vmem_cap = max(8, ((vmem_budget - 2 * weight_bytes) // max(per_row_bytes, 1)) // 8 * 8)

    if M <= 8:
        tile_m = M                      # single block; block dim == full array dim is legal
    else:
        # >= 2 grid steps on the "parallel" M axis so both v7x TCs get work.
        tile_m = max(8, min(max_tile_m, vmem_cap, _round_up(pl.cdiv(M, 2), 8)))

    Mp = _round_up(M, tile_m)
    if Mp != M:
        # Zero rows (not Pallas partial/OOB blocks) so padded-row loads are defined.
        x2d = jnp.pad(x2d, ((0, Mp - M), (0, 0)))
    grid = (Mp // tile_m,)

    # ---- specs ---------------------------------------------------------------
    # x / out tile over M only; last block dim equals the full feature dim
    # (legal regardless of the (8,128) rule).  Weights & biases use a constant
    # index_map so they stay VMEM-resident across the grid.
    in_specs = [pl.BlockSpec((tile_m, in_dim), lambda i: (i, 0))]
    flat_inputs = [x2d]
    for (wp, bp) in prepared_params:
        in_specs.append(pl.BlockSpec(wp.shape, lambda i: (0, 0)))
        in_specs.append(pl.BlockSpec(bp.shape, lambda i: (0, 0)))
        flat_inputs.append(wp)
        flat_inputs.append(bp)
    out_specs = pl.BlockSpec((tile_m, out_dim), lambda i: (i, 0))

    # Honest advisory cost estimate (post-layout-change traffic).
    flops = sum(2 * Mp * w.shape[0] * w.shape[1] for (w, _) in prepared_params)
    bytes_accessed = (x2d.size * x2d.dtype.itemsize
                      + weight_bytes
                      + Mp * out_dim * 4)

    compute_dtype = prepared_params[0][0].dtype

    out = pl.pallas_call(
        functools.partial(_mlp_kernel, num_layers=num_layers,
                          compute_dtype=compute_dtype),
        out_shape=jax.ShapeDtypeStruct((Mp, out_dim), jnp.float32),
        grid=grid,
        in_specs=in_specs,
        out_specs=out_specs,
        compiler_params=pltpu.CompilerParams(
            dimension_semantics=("parallel",),        # dual-TC split on v7x
            vmem_limit_bytes=32 * 1024 * 1024),       # explicit, generation-safe budget
        cost_estimate=pl.CostEstimate(
            flops=flops, transcendentals=0, bytes_accessed=bytes_accessed),
    )(*flat_inputs)

    if Mp != M:
        out = out[:M]
    return out.reshape(*lead_shape, out_dim)


# ---------------------------------------------------------------------------
# Parameter init (mirrors nn.Linear defaults; weights stored as (in, out))
# ---------------------------------------------------------------------------
def init_mlp_params(key, input_dim, hidden_dim, output_dim, num_layers):
    h = [hidden_dim] * (num_layers - 1)
    dims_in = [input_dim] + h
    dims_out = h + [output_dim]
    params = []
    for n_in, n_out in zip(dims_in, dims_out):
        key, kw, kb = jax.random.split(key, 3)
        bound = 1.0 / math.sqrt(n_in)
        w = jax.random.uniform(kw, (n_in, n_out), jnp.float32, -bound, bound)
        b = jax.random.uniform(kb, (1, n_out), jnp.float32, -bound, bound)
        params.append((w, b))
    return params


# Pure-JAX reference with matching bf16 matmul inputs / f32 accumulation.
# NOTE: vs a pure-f32 torch MLP this is a deliberate (inference-grade) precision drop.
def mlp_ref(params, x, compute_dtype=jnp.bfloat16):
    lead_shape = x.shape[:-1]
    h = x.reshape(-1, x.shape[-1]).astype(jnp.float32)
    n = len(params)
    for i, (w, b) in enumerate(params):
        y = jnp.dot(h.astype(compute_dtype), w.astype(compute_dtype),
                    preferred_element_type=jnp.float32) + b.astype(jnp.float32)
        h = jnp.maximum(y, 0.0) if i < n - 1 else y
    return h.reshape(*lead_shape, params[-1][0].shape[1])


if __name__ == "__main__":
    key = jax.random.PRNGKey(0)
    k_params, k_x = jax.random.split(key)

    # Small shapes consistent with the module: MLP(16 -> 32 -> 32 -> 8), 3 layers
    input_dim, hidden_dim, output_dim, num_layers = 16, 32, 8, 3
    batch, seq = 2, 8

    params = init_mlp_params(k_params, input_dim, hidden_dim, output_dim, num_layers)
    prepared = prepare_mlp_params(params)          # one-time weight cast (hoisted)
    x = jax.random.normal(k_x, (batch, seq, input_dim), jnp.float32)

    out = mlp_forward(prepared, x)
    out = jax.block_until_ready(out)

    ref = mlp_ref(params, x)
    assert out.shape == (batch, seq, output_dim)
    assert out.dtype == jnp.float32
    assert jnp.allclose(out, ref, atol=1e-3, rtol=1e-3), (
        float(jnp.max(jnp.abs(out - ref))))

    print("KERNEL_OK")
</pallas_src>

<mosaic_0001>
module attributes {stable_mosaic.version = 11 : i64} {
  func.func @_mlp_kernel(%arg0: i32, %arg1: memref<8x16xf32, #tpu.memory_space<vmem>>, %arg2: memref<16x32xbf16, #tpu.memory_space<vmem>>, %arg3: memref<1x32xf32, #tpu.memory_space<vmem>>, %arg4: memref<32x32xbf16, #tpu.memory_space<vmem>>, %arg5: memref<1x32xf32, #tpu.memory_space<vmem>>, %arg6: memref<32x8xbf16, #tpu.memory_space<vmem>>, %arg7: memref<1x8xf32, #tpu.memory_space<vmem>>, %arg8: memref<8x8xf32, #tpu.memory_space<vmem>>) attributes {dimension_semantics = [#tpu.dimension_semantics<parallel>], iteration_bounds = array<i64: 2>, scalar_prefetch = 0 : i64, scratch_operands = 0 : i64, tpu.core_type = #tpu.core_type<tc>, window_params = [{transform_indices = @transform_0, window_bounds = array<i64: 8, 16>}, {pipeline_mode = #tpu.pipeline_mode<synchronous>, transform_indices = @transform_1, window_bounds = array<i64: 16, 32>}, {pipeline_mode = #tpu.pipeline_mode<synchronous>, transform_indices = @transform_2, window_bounds = array<i64: 1, 32>}, {pipeline_mode = #tpu.pipeline_mode<synchronous>, transform_indices = @transform_3, window_bounds = array<i64: 32, 32>}, {pipeline_mode = #tpu.pipeline_mode<synchronous>, transform_indices = @transform_4, window_bounds = array<i64: 1, 32>}, {pipeline_mode = #tpu.pipeline_mode<synchronous>, transform_indices = @transform_5, window_bounds = array<i64: 32, 8>}, {pipeline_mode = #tpu.pipeline_mode<synchronous>, transform_indices = @transform_6, window_bounds = array<i64: 1, 8>}, {transform_indices = @transform_7, window_bounds = array<i64: 8, 8>}]} {
    %c0 = arith.constant 0 : index
    %c0_0 = arith.constant 0 : index
    %0 = vector.load %arg1[%c0, %c0_0] : memref<8x16xf32, #tpu.memory_space<vmem>>, vector<8x16xf32>
    %1 = arith.truncf %0 : vector<8x16xf32> to vector<8x16xbf16>
    %c0_1 = arith.constant 0 : index
    %c0_2 = arith.constant 0 : index
    %2 = vector.load %arg2[%c0_1, %c0_2] : memref<16x32xbf16, #tpu.memory_space<vmem>>, vector<16x32xbf16>
    %c0_3 = arith.constant 0 : index
    %c0_4 = arith.constant 0 : index
    %3 = vector.load %arg3[%c0_3, %c0_4] : memref<1x32xf32, #tpu.memory_space<vmem>>, vector<1x32xf32>
    %cst = arith.constant dense<0.000000e+00> : vector<8x32xf32>
    %4 = tpu.matmul %1, %2, %cst {dimension_numbers = #tpu.dot_dimension_numbers<[1], [0], [0], [1], [0, 0, 1, 1], [], []>} : vector<8x16xbf16>, vector<16x32xbf16>, vector<8x32xf32> -> vector<8x32xf32>
    %5 = vector.broadcast %3 : vector<1x32xf32> to vector<8x32xf32>
    %6 = arith.addf %4, %5 : vector<8x32xf32>
    %cst_5 = arith.constant 0.000000e+00 : f32
    %7 = vector.broadcast %cst_5 : f32 to vector<8x32xf32>
    %8 = arith.maximumf %6, %7 : vector<8x32xf32>
    %9 = arith.truncf %8 : vector<8x32xf32> to vector<8x32xbf16>
    %c0_6 = arith.constant 0 : index
    %c0_7 = arith.constant 0 : index
    %10 = vector.load %arg4[%c0_6, %c0_7] : memref<32x32xbf16, #tpu.memory_space<vmem>>, vector<32x32xbf16>
    %c0_8 = arith.constant 0 : index
    %c0_9 = arith.constant 0 : index
    %11 = vector.load %arg5[%c0_8, %c0_9] : memref<1x32xf32, #tpu.memory_space<vmem>>, vector<1x32xf32>
    %cst_10 = arith.constant dense<0.000000e+00> : vector<8x32xf32>
    %12 = tpu.matmul %9, %10, %cst_10 {dimension_numbers = #tpu.dot_dimension_numbers<[1], [0], [0], [1], [0, 0, 1, 1], [], []>} : vector<8x32xbf16>, vector<32x32xbf16>, vector<8x32xf32> -> vector<8x32xf32>
    %13 = vector.broadcast %11 : vector<1x32xf32> to vector<8x32xf32>
    %14 = arith.addf %12, %13 : vector<8x32xf32>
    %cst_11 = arith.constant 0.000000e+00 : f32
    %15 = vector.broadcast %cst_11 : f32 to vector<8x32xf32>
    %16 = arith.maximumf %14, %15 : vector<8x32xf32>
    %17 = arith.truncf %16 : vector<8x32xf32> to vector<8x32xbf16>
    %c0_12 = arith.constant 0 : index
    %c0_13 = arith.constant 0 : index
    %18 = vector.load %arg6[%c0_12, %c0_13] : memref<32x8xbf16, #tpu.memory_space<vmem>>, vector<32x8xbf16>
    %c0_14 = arith.constant 0 : index
    %c0_15 = arith.constant 0 : index
    %19 = vector.load %arg7[%c0_14, %c0_15] : memref<1x8xf32, #tpu.memory_space<vmem>>, vector<1x8xf32>
    %cst_16 = arith.constant dense<0.000000e+00> : vector<8x8xf32>
    %20 = tpu.matmul %17, %18, %cst_16 {dimension_numbers = #tpu.dot_dimension_numbers<[1], [0], [0], [1], [0, 0, 1, 1], [], []>} : vector<8x32xbf16>, vector<32x8xbf16>, vector<8x8xf32> -> vector<8x8xf32>
    %21 = vector.broadcast %19 : vector<1x8xf32> to vector<8x8xf32>
    %22 = arith.addf %20, %21 : vector<8x8xf32>
    %c0_17 = arith.constant 0 : index
    %c0_18 = arith.constant 0 : index
    %23 = vector.load %arg8[%c0_17, %c0_18] : memref<8x8xf32, #tpu.memory_space<vmem>>, vector<8x8xf32>
    tpu.vector_store %arg8[%c0_17, %c0_18], %22 {strides = array<i32>} : memref<8x8xf32, #tpu.memory_space<vmem>>, vector<8x8xf32>,
    return
  }
  func.func @transform_0(%arg0: i32) -> (i32, i32) {
    %c0_i32 = arith.constant 0 : i32
    %c0_i32_0 = arith.constant 0 : i32
    return %arg0, %c0_i32 : i32, i32
  }
  func.func @transform_1(%arg0: i32) -> (i32, i32) {
    %c0_i32 = arith.constant 0 : i32
    %c0_i32_0 = arith.constant 0 : i32
    %c0_i32_1 = arith.constant 0 : i32
    return %c0_i32, %c0_i32_0 : i32, i32
  }
  func.func @transform_2(%arg0: i32) -> (i32, i32) {
    %c0_i32 = arith.constant 0 : i32
    %c0_i32_0 = arith.constant 0 : i32
    %c0_i32_1 = arith.constant 0 : i32
    return %c0_i32, %c0_i32_0 : i32, i32
  }
  func.func @transform_3(%arg0: i32) -> (i32, i32) {
    %c0_i32 = arith.constant 0 : i32
    %c0_i32_0 = arith.constant 0 : i32
    %c0_i32_1 = arith.constant 0 : i32
    return %c0_i32, %c0_i32_0 : i32, i32
  }
  func.func @transform_4(%arg0: i32) -> (i32, i32) {
    %c0_i32 = arith.constant 0 : i32
    %c0_i32_0 = arith.constant 0 : i32
    %c0_i32_1 = arith.constant 0 : i32
    return %c0_i32, %c0_i32_0 : i32, i32
  }
  func.func @transform_5(%arg0: i32) -> (i32, i32) {
    %c0_i32 = arith.constant 0 : i32
    %c0_i32_0 = arith.constant 0 : i32
    %c0_i32_1 = arith.constant 0 : i32
    return %c0_i32, %c0_i32_0 : i32, i32
  }
  func.func @transform_6(%arg0: i32) -> (i32, i32) {
    %c0_i32 = arith.constant 0 : i32
    %c0_i32_0 = arith.constant 0 : i32
    %c0_i32_1 = arith.constant 0 : i32
    return %c0_i32, %c0_i32_0 : i32, i32
  }
  func.func @transform_7(%arg0: i32) -> (i32, i32) {
    %c0_i32 = arith.constant 0 : i32
    %c0_i32_0 = arith.constant 0 : i32
    return %arg0, %c0_i32 : i32, i32
  }
}

</mosaic_0001>

<bundles_post_ra>
// kernel: tpu_custom_call.1
= control target key start
LH: loop header
LB: loop body
LE: loop exit
PB: predicated region body
PF: predicated region fallthrough
CT: control target
= control target key end

     0   :  { %12 = vsyncpa [#allocation3], 0  ;;  %s905_s0 = inlined_call_operand.vmem [shape: f32[16,16], index: 0, kind: input, shape index: {}]   ;;  %s906_s1 = inlined_call_operand.hbm [shape: bf16[16,32], index: 1, kind: input, shape index: {}]   ;;  %s907_s2 = inlined_call_operand.vmem [shape: f32[1,32], index: 2, kind: input, shape index: {}]   ;;  %s908_s3 = inlined_call_operand.hbm [shape: bf16[32,32], index: 3, kind: input, shape index: {}]   ;;  %s909_s4 = inlined_call_operand.vmem [shape: f32[1,32], index: 4, kind: input, shape index: {}]   ;;  %s910_s5 = inlined_call_operand.vmem [shape: bf16[32,8], index: 5, kind: input, shape index: {}]   ;;  %s911_s6 = inlined_call_operand.vmem [shape: f32[1,8], index: 6, kind: input, shape index: {}]   ;;  %s912_s7 = inlined_call_operand.vmem [shape: f32[16,8], index: 7, kind: output, shape index: {}]  }
   0x1   :  { %13 = vsyncpa [#allocation5], 0  ;;  %s790_s24 = smov 0  }
   0x2 LB: > { %s796_s25 = sadd.s32 4294967295, %s742_s24   ;;  %p582_p0 = scmp.ge.s32.totalorder %s742_s24, 1  ;;  %s742_s24 = sphi %s790_s24, %s19_s24  }
   0x3   : > { %p202_p1 = scmp.lt.s32.totalorder %s742_s24, 3  ;;  %s744_s26 = smov [#allocation2]  }
   0x4   : > { %s214_s27 = sshll.u32 %s744_s26, 4  ;;  %p913_p3 = scmp.eq.s32.totalorder %s796_s25, 0  ;;  %s215_s27 = int_to_ptr.vmem [resolvable:$true] %s214_s27 }
   0x5   : > { %p800_p2 = pnand %p582_p0, %p202_p1  ;;  %s745_s29 = smov [#allocation4]  }
   0x6   : > { %s230_s30 = sshll.u32 %s745_s29, 4  ;;  %s672_s11 = scalar_lea.hbm %s906_s1, 128  ;;  %s813_s30 = int_to_ptr.vmem [resolvable:$true] %s230_s30 }
   0x7   : > { %s915_s28 = scalar_select %p800_p2, 1, 0 }
   0x8   : > { %p642_p4 = pneg %p800_p2  ;;  %p673_p6 = scmp.ne.s32.totalorder %s906_s1, %s672_s11 }
   0x9   : > { %p679_p10 = scmp.lt.u32.totalorder %s672_s11, %s906_s1 }
   0xa   : > { %p809_p5 = pnand %p913_p3, %p642_p4 }
   0xc   : > { %p674_p7 = pneg %p809_p5 }
   0xe   : > { %p675_p8 = pnand %p674_p7, %p673_p6 }
  0x10   : > { %p676_p9 = pneg %p675_p8 }
  0x12   : > { %p681_p11 = pnand %p679_p10, %p676_p9 }
  0x14   : > { %684 = shalt.err (!%p681_p11)
}
  0x15   : > { %s685_s16 = scalar_lea.vmem %s215_s27, 128  ;;  %p693_p1 = scmp.lt.s32.totalorder %s215_s27, %s215_s27 }
  0x16   : > { %p686_p12 = scmp.ne.s32.totalorder %s215_s27, %s685_s16  ;;  %p694_p4 = scmp.lt.s32.totalorder %s685_s16, %s685_s16 }
  0x18   : > { %p688_p13 = pnand %p686_p12, %p674_p7  ;;  %p695_p3 = por %p694_p4, %p693_p1 }
  0x1a   : > { %p689_p0 = pneg %p688_p13 }
  0x1c   : > { %p696_p2 = pnand %p695_p3, %p689_p0 }
  0x1e   : > { %699 = shalt.err (!%p696_p2)
}
  0x1f   : > { %s746_s17 = smov 64   ;;  %s747_s18 = smov 4  }
  0x20   : > { %645 = dma.hbm_to_vmem [thread:$0]  (!%p809_p5), %s906_s1, 128, %s215_s27, [#allocation3], %s746_s17, %s746_s17, %s747_s18  }
  0x21   : > { %s700_s23 = scalar_lea.hbm %s908_s3, 256 }
  0x22   : > { %p701_p6 = scmp.ne.s32.totalorder %s908_s3, %s700_s23  ;;  %p707_p8 = scmp.lt.u32.totalorder %s700_s23, %s908_s3 }
  0x24   : > { %p703_p2 = pnand %p701_p6, %p674_p7 }
  0x26   : > { %p704_p3 = pneg %p703_p2 }
  0x28   : > { %p709_p9 = pnand %p707_p8, %p704_p3 }
  0x2a   : > { %712 = shalt.err (!%p709_p9)
}
  0x2b   : > { %s713_s27 = scalar_lea.vmem %s813_s30, 256  ;;  %p721_p13 = scmp.lt.s32.totalorder %s813_s30, %s813_s30 }
  0x2c   : > { %p714_p10 = scmp.ne.s32.totalorder %s813_s30, %s713_s27  ;;  %p722_p0 = scmp.lt.s32.totalorder %s713_s27, %s713_s27 }
  0x2e   : > { %p716_p11 = pnand %p714_p10, %p674_p7  ;;  %p723_p1 = por %p722_p0, %p721_p13 }
  0x30   : > { %p717_p12 = pneg %p716_p11 }
  0x32   : > { %p724_p4 = pnand %p723_p1, %p717_p12 }
  0x34   : > { %727 = shalt.err (!%p724_p4)
}
  0x35   : > { %648 = dma.hbm_to_vmem [thread:$0]  (!%p809_p5), %s908_s3, 256, %s813_s30, [#allocation5], %s746_s17, %s746_s17, %s747_s18  }
  0x36   : > { %p917_p6 = scmp.ne.s32.totalorder %s915_s28, 0 }
  0x37   : > { %p918_p2 = scmp.eq.s32.totalorder (!%p917_p6), %s796_s25, 0 }
  0x38   : > { %262 = sbr.rel (%p917_p6) target bundleno = 726 (0x2d6), region = 48 }
  0x3f   : > { %733 = dma.done.wait (%p918_p2), [#allocation3], 128   ;;  %p919_p7 = pmov %p918_p2 }
  0x40   : > { %p920_p3 = pmov %p918_p2 }
  0x41   : > { %735 = vsyncadd (%p919_p7), [#allocation3], 4294967168 }
  0x42   : > { %737 = dma.done.wait (%p920_p3), [#allocation5], 256   ;;  %p921_p8 = pmov %p918_p2 }
  0x43   : > { %p296_p9 = scmp.lt.s32.totalorder %s796_s25, 1  ;;  %v748_v0 = vmov 0.0   ;;  %vm749_vm0 = vmmov 0   ;;  %v667_v1 = vld [vmem:[#allocation2] sm:$0xff]   ;;  %vm322_vm1 = vcmask 130048   ;;  %v668_v4 = vld [vmem:[#allocation4] sm:$0xff]  }
  0x44   : > { %739 = vsyncadd (%p921_p8), [#allocation5], 4294967040  ;;  %612 = vmatprep.subr.bf16.mxu0 %v748_v0  ;;  %614 = vmatprep.mubr.msk.bf16.mxu0 %vm749_vm0, %v748_v0  ;;  %v669_v5 = vld [vmem:[#allocation4 + $0x8] sm:$0xff]   ;;  %v670_v6 = vld [vmem:[%s910_s5] sm:$0xff]   ;;  %vm391_vm2 = vcmask 261120   ;;  %vm503_vm3 = vcmask 64512  }
  0x45   : > { %s923_s25 = smov (!%p296_p9, %s796_s25), 1  ;;  %618 = vmatprep.subr.bf16.mxu1 %v748_v0  ;;  %622 = vmatprep.mubr.msk.bf16.mxu1 %vm749_vm0, %v748_v0  ;;  %v591_v7 = vld [vmem:[%s907_s2] ss:$0 sm:$0xff]  ;;  %v671_v15 = vld [vmem:[%s910_s5 + $0x8] sm:$0xff]  }
  0x46   : > { %s589_s28 = sshll.u32 %s923_s25, 3  ;;  %613 = vmatpush3.bf16.msra.mxu0 %v667_v1  ;;  %619 = vmatpush3.bf16.msra.mxu1 %v668_v4  ;;  %v594_v16 = vld [vmem:[%s909_s4] ss:$0 sm:$0xff] }
  0x47   : > { %s299_s13 = scalar_lea.vmem %s905_s0, %s589_s28  ;;  %626 = vmatprep.subr.bf16.mxu0 %v748_v0  ;;  %620 = vmatprep.subr.bf16.mxu1 %v748_v0  ;;  %v598_v24 = vld [vmem:[%s911_s6] ss:$0 sm:$0xff]  ;;  %s303_s9 = scalar_lea.vmem %s912_s7, %s589_s28 }
  0x48   : > { %v305_v2 = vld [vmem:[%s299_s13] sm:$0xff] }
  0x49   : > { %v306_v3 = vpack.c.bf16 %v305_v2, %v305_v2 }
  0x4a   : > { %621 = vmatpush3.bf16.msra.mxu1 %v669_v5 }
  0x4b   : > { %615 = vmatmul.mubr.msk.bf16.vlgmr.msra.gmra.mrb[0].mxu0 %vm322_vm1, %v306_v3 }
  0x4c   : > { %630 = vmatprep.mubr.msk.bf16.mxu0 %vm749_vm0, %v748_v0  ;;  %627 = vmatpush3.bf16.msra.mxu0 %v670_v6 }
  0x4d   : > { %628 = vmatprep.subr.bf16.mxu0 %v748_v0 }
  0x50   : > { %629 = vmatpush3.bf16.msra.mxu0 %v671_v15 }
 0x11e   : > { %v360_v8 = vpop.f32.mrb[0].mxu0 }
 0x11f   : > { %v361_v9 = vadd.f32 %v591_v7, %v360_v8  ;;  %v616_v10 = vpop.f32.mrb[1].mxu0 }
 0x120   : > { %v363_v11 = vpop.f32.mrb[2].mxu0 }
 0x121   : > { %v366_v12 = vmax.f32 %v361_v9, 0.0  ;;  %v617_v13 = vpop.f32.mrb[3].mxu0 }
 0x123   : > { %v367_v14 = vpack.c.bf16 %v366_v12, %v366_v12 }
 0x125   : > { %623 = vmatmul.mubr.msk.bf16.vlgmr.msra.gmra.mrb[0].mxu1 %vm391_vm2, %v367_v14 }
 0x1f8   : > { %v429_v17 = vpop.f32.mrb[0].mxu1 }
 0x1f9   : > { %v430_v18 = vadd.f32 %v594_v16, %v429_v17  ;;  %v624_v19 = vpop.f32.mrb[1].mxu1 }
 0x1fa   : > { %v432_v20 = vpop.f32.mrb[2].mxu1 }
 0x1fb   : > { %v435_v21 = vmax.f32 %v430_v18, 0.0  ;;  %v625_v22 = vpop.f32.mrb[3].mxu1 }
 0x1fd   : > { %v436_v23 = vpack.c.bf16 %v435_v21, %v435_v21 }
 0x1ff   : > { %631 = vmatmul.mubr.msk.bf16.vlgmr.msra.gmra.mrb[4].mxu0 %vm391_vm2, %v436_v23 }
 0x2d2   : > { %v497_v25 = vpop.f32.mrb[4].mxu0 }
 0x2d3   : > { %v498_v26 = vadd.f32 %v598_v24, %v497_v25  ;;  %v632_v27 = vpop.f32.mrb[5].mxu0 }
 0x2d4   : > { %v500_v28 = vpop.f32.mrb[6].mxu0 }
 0x2d5   : > { %504 = vst.msk [vmem:[%s303_s9] sm:$0xff] %vm503_vm3, %v498_v26  ;;  %v633_v29 = vpop.f32.mrb[7].mxu0 }
 0x2d6 PF: > { %s19_s24 = sadd.s32 1, %s742_s24  }
 0x2d7   : > { %p16_p5 = scmp.ge.s32.totalorder %s19_s24, 4  }
 0x2d9   :  { %18 = sbr.rel (!%p16_p5) target bundleno = 2 (0x2), region = 87 }
 0x2e0   :  { %524 = vsyncpa [#allocation3], 1 }
 0x2e1   :  { %526 = vsyncpa [#allocation3 + $0x1], 1 }
 0x2e2   :  { %527 = vsyncpa [#allocation5], 1 }

</bundles_post_ra>
